<compile_context>
chip_gen: v5e
topology: v5e:2x2
jax: 0.10.0
libtpu: 0.0.40
codegen_flags: <defaults>
</compile_context>

<pallas_src>
import functools

import jax
import jax.numpy as jnp
from jax.experimental import pallas as pl
from jax.experimental.pallas import tpu as pltpu


# ----------------------------------------------------------------------------
# helpers
# ----------------------------------------------------------------------------
def _row_tile(m, max_tile=512):
    """Largest row tile (multiple of native sublane tiling) dividing m."""
    for t in (512, 256, 128, 64, 32, 16):
        if t <= max_tile and t <= m and m % t == 0:
            return t
    return m  # small / odd M -> single full-extent block


_PARALLEL_1D = pltpu.CompilerParams(dimension_semantics=("parallel",))


# ----------------------------------------------------------------------------
# Pallas kernels
# ----------------------------------------------------------------------------
def _dense_kernel(x_ref, w_ref, b_ref, o_ref, *, activation):
    """out = act(x @ w + b); bf16 MXU inputs, f32 accumulation."""
    acc = jnp.dot(x_ref[...], w_ref[...], preferred_element_type=jnp.float32)
    acc = acc + b_ref[...]
    if activation == "gelu":  # exact erf GELU (HF BERT default)
        acc = 0.5 * acc * (1.0 + jax.lax.erf(acc * jnp.float32(0.7071067811865476)))
    elif activation == "tanh":
        acc = jnp.tanh(acc)
    o_ref[...] = acc.astype(o_ref.dtype)


def dense(x, w, b, activation="none", out_dtype=None):
    M, K = x.shape
    N = w.shape[1]
    out_dtype = out_dtype or x.dtype
    tm = _row_tile(M)
    kern = functools.partial(_dense_kernel, activation=activation)
    return pl.pallas_call(
        kern,
        out_shape=jax.ShapeDtypeStruct((M, N), out_dtype),
        grid=(M // tm,),
        in_specs=[
            pl.BlockSpec((tm, K), lambda i: (i, 0)),
            pl.BlockSpec((K, N), lambda i: (0, 0)),
            pl.BlockSpec((1, N), lambda i: (0, 0)),
        ],
        out_specs=pl.BlockSpec((tm, N), lambda i: (i, 0)),
        compiler_params=_PARALLEL_1D,
    )(x, w, b.reshape(1, N))


def _ln_kernel(x_ref, g_ref, b_ref, o_ref, *, eps):
    """LayerNorm over last axis (no residual input)."""
    x = x_ref[...].astype(jnp.float32)
    mean = jnp.mean(x, axis=-1, keepdims=True)
    var = jnp.mean((x - mean) ** 2, axis=-1, keepdims=True)
    y = (x - mean) * jax.lax.rsqrt(var + eps)
    o_ref[...] = (y * g_ref[...] + b_ref[...]).astype(o_ref.dtype)


def layernorm(x, gamma, beta, eps=1e-12, out_dtype=jnp.bfloat16):
    M, H = x.shape
    tm = _row_tile(M)
    kern = functools.partial(_ln_kernel, eps=eps)
    return pl.pallas_call(
        kern,
        out_shape=jax.ShapeDtypeStruct((M, H), out_dtype),
        grid=(M // tm,),
        in_specs=[
            pl.BlockSpec((tm, H), lambda i: (i, 0)),
            pl.BlockSpec((1, H), lambda i: (0, 0)),
            pl.BlockSpec((1, H), lambda i: (0, 0)),
        ],
        out_specs=pl.BlockSpec((tm, H), lambda i: (i, 0)),
        compiler_params=_PARALLEL_1D,
    )(x, gamma.reshape(1, H), beta.reshape(1, H))


def _dense_add_ln_kernel(x_ref, w_ref, b_ref, r_ref, g_ref, beta_ref, o_ref, *, eps):
    """out = LayerNorm(x @ w + b + residual) * gamma + beta (fused epilogue)."""
    acc = jnp.dot(x_ref[...], w_ref[...], preferred_element_type=jnp.float32)
    acc = acc + b_ref[...] + r_ref[...].astype(jnp.float32)
    mean = jnp.mean(acc, axis=-1, keepdims=True)
    var = jnp.mean((acc - mean) ** 2, axis=-1, keepdims=True)
    y = (acc - mean) * jax.lax.rsqrt(var + eps)
    o_ref[...] = (y * g_ref[...] + beta_ref[...]).astype(o_ref.dtype)


def dense_add_layernorm(x, w, b, res, gamma, beta, eps=1e-12):
    M, K = x.shape
    N = w.shape[1]
    tm = _row_tile(M)
    kern = functools.partial(_dense_add_ln_kernel, eps=eps)
    return pl.pallas_call(
        kern,
        out_shape=jax.ShapeDtypeStruct((M, N), res.dtype),
        grid=(M // tm,),
        in_specs=[
            pl.BlockSpec((tm, K), lambda i: (i, 0)),
            pl.BlockSpec((K, N), lambda i: (0, 0)),
            pl.BlockSpec((1, N), lambda i: (0, 0)),
            pl.BlockSpec((tm, N), lambda i: (i, 0)),
            pl.BlockSpec((1, N), lambda i: (0, 0)),
            pl.BlockSpec((1, N), lambda i: (0, 0)),
        ],
        out_specs=pl.BlockSpec((tm, N), lambda i: (i, 0)),
        compiler_params=_PARALLEL_1D,
    )(x, w, b.reshape(1, N), res, gamma.reshape(1, N), beta.reshape(1, N))


def _qkv_attn_kernel(x_ref, w_ref, b_ref, o_ref, *, nheads, scale):
    """Fused QKV projection + scaled-dot-product attention for one batch element.

    x_ref : (1, S, H) bf16 ;  w_ref : (3, nH, H, Dh) bf16 ;  b_ref : (3, nH, 1, Dh) f32
    o_ref : (1, nH, S, Dh) bf16  (heads kept on a leading dim -> aligned stores)
    """
    # TODO(synk): no attention / padding mask (inputs are fixed-length, unpadded).
    x = x_ref[0]  # (S, H) bf16
    for h in range(nheads):
        q = (jnp.dot(x, w_ref[0, h], preferred_element_type=jnp.float32)
             + b_ref[0, h]).astype(jnp.bfloat16)
        k = (jnp.dot(x, w_ref[1, h], preferred_element_type=jnp.float32)
             + b_ref[1, h]).astype(jnp.bfloat16)
        v = (jnp.dot(x, w_ref[2, h], preferred_element_type=jnp.float32)
             + b_ref[2, h]).astype(jnp.bfloat16)
        # NT matmul via dot_general (no in-kernel transpose of k).
        s = jax.lax.dot_general(q, k, (((1,), (1,)), ((), ())),
                                preferred_element_type=jnp.float32) * scale
        s = s - jnp.max(s, axis=-1, keepdims=True)
        p = jnp.exp(s)
        p = p * pl.reciprocal(jnp.sum(p, axis=-1, keepdims=True), approx=True)
        ctx = jnp.dot(p.astype(jnp.bfloat16), v, preferred_element_type=jnp.float32)
        o_ref[0, h] = ctx.astype(o_ref.dtype)


def fused_qkv_attention(x3, wqkv, bqkv, num_heads):
    B, S, H = x3.shape
    Dh = H // num_heads
    scale = 1.0 / float(Dh) ** 0.5
    kern = functools.partial(_qkv_attn_kernel, nheads=num_heads, scale=scale)
    return pl.pallas_call(
        kern,
        out_shape=jax.ShapeDtypeStruct((B, num_heads, S, Dh), x3.dtype),
        grid=(B,),
        in_specs=[
            pl.BlockSpec((1, S, H), lambda b: (b, 0, 0)),
            pl.BlockSpec((3, num_heads, H, Dh), lambda b: (0, 0, 0, 0)),
            pl.BlockSpec((3, num_heads, 1, Dh), lambda b: (0, 0, 0, 0)),
        ],
        out_specs=pl.BlockSpec((1, num_heads, S, Dh), lambda b: (b, 0, 0, 0)),
        compiler_params=_PARALLEL_1D,
    )(x3, wqkv, bqkv)


def _ctx_proj_ln_kernel(ctx_ref, w_ref, b_ref, r_ref, g_ref, beta_ref, o_ref,
                        *, nheads, eps):
    """Fused attention-output projection + residual add + LayerNorm.

    ctx_ref : (1, nH, S, Dh) bf16 ; w_ref : (nH, Dh, H) bf16 ; r_ref : (1, S, H) bf16
    """
    acc = r_ref[0].astype(jnp.float32) + b_ref[...]          # (S, H)
    for h in range(nheads):
        acc = acc + jnp.dot(ctx_ref[0, h], w_ref[h],
                            preferred_element_type=jnp.float32)
    mean = jnp.mean(acc, axis=-1, keepdims=True)
    var = jnp.mean((acc - mean) ** 2, axis=-1, keepdims=True)
    y = (acc - mean) * jax.lax.rsqrt(var + eps)
    o_ref[0] = (y * g_ref[...] + beta_ref[...]).astype(o_ref.dtype)


def attn_out_layernorm(ctx, wo, bo, res3, gamma, beta, eps=1e-12):
    B, nH, S, Dh = ctx.shape
    H = nH * Dh
    kern = functools.partial(_ctx_proj_ln_kernel, nheads=nH, eps=eps)
    return pl.pallas_call(
        kern,
        out_shape=jax.ShapeDtypeStruct((B, S, H), res3.dtype),
        grid=(B,),
        in_specs=[
            pl.BlockSpec((1, nH, S, Dh), lambda b: (b, 0, 0, 0)),
            pl.BlockSpec((nH, Dh, H), lambda b: (0, 0, 0)),
            pl.BlockSpec((1, H), lambda b: (0, 0)),
            pl.BlockSpec((1, S, H), lambda b: (b, 0, 0)),
            pl.BlockSpec((1, H), lambda b: (0, 0)),
            pl.BlockSpec((1, H), lambda b: (0, 0)),
        ],
        out_specs=pl.BlockSpec((1, S, H), lambda b: (b, 0, 0)),
        compiler_params=_PARALLEL_1D,
    )(ctx, wo, bo.reshape(1, H), res3, gamma.reshape(1, H), beta.reshape(1, H))


# ----------------------------------------------------------------------------
# Small "bert-base-uncased"-shaped (scaled down) BertForSequenceClassification
# ----------------------------------------------------------------------------
CFG = dict(vocab=100, max_pos=16, hidden=32, heads=4, intermediate=64,
           layers=2, num_labels=3)


def init_params(key, cfg):
    H, I, nH = cfg["hidden"], cfg["intermediate"], cfg["heads"]
    Dh = H // nH

    def nrm(k, shape, dtype=jnp.bfloat16):
        return (jax.random.normal(k, shape, dtype=jnp.float32) * 0.02).astype(dtype)

    keys = iter(jax.random.split(key, 128))
    p = {
        "word_emb": nrm(next(keys), (cfg["vocab"], H), jnp.float32),
        "pos_emb": nrm(next(keys), (cfg["max_pos"], H), jnp.float32),
        "type_emb": nrm(next(keys), (2, H), jnp.float32),
        "emb_ln_g": jnp.ones((H,), jnp.float32),
        "emb_ln_b": jnp.zeros((H,), jnp.float32),
        "pool_w": nrm(next(keys), (H, H)),
        "pool_b": jnp.zeros((H,), jnp.float32),
        "cls_w": nrm(next(keys), (H, cfg["num_labels"])),
        "cls_b": jnp.zeros((cfg["num_labels"],), jnp.float32),
        "layers": [],
    }
    for _ in range(cfg["layers"]):
        p["layers"].append({
            # fused, head-major QKV projection weights (== concat(Wq, Wk, Wv))
            "wqkv": nrm(next(keys), (3, nH, H, Dh)),
            "bqkv": jnp.zeros((3, nH, 1, Dh), jnp.float32),
            # head-major attention output projection (== Wo)
            "wo": nrm(next(keys), (nH, Dh, H)),
            "bo": jnp.zeros((H,), jnp.float32),
            "ln1_g": jnp.ones((H,), jnp.float32), "ln1_b": jnp.zeros((H,), jnp.float32),
            "w1": nrm(next(keys), (H, I)), "b1": jnp.zeros((I,), jnp.float32),
            "w2": nrm(next(keys), (I, H)), "b2": jnp.zeros((H,), jnp.float32),
            "ln2_g": jnp.ones((H,), jnp.float32), "ln2_b": jnp.zeros((H,), jnp.float32),
        })
    return p


def bert_forward(params, input_ids, cfg):
    """Equivalent of `self.bert(pair).logits` in the PyTorch module."""
    B, S = input_ids.shape
    H, nH = cfg["hidden"], cfg["heads"]

    # --- embeddings (gathers are glue; LayerNorm is a Pallas kernel, no dummy residual) ---
    emb = (jnp.take(params["word_emb"], input_ids, axis=0)
           + params["pos_emb"][:S][None, :, :]
           + params["type_emb"][0][None, None, :])           # token_type_ids = 0
    x = layernorm(emb.reshape(B * S, H).astype(jnp.float32),
                  params["emb_ln_g"], params["emb_ln_b"])     # bf16 (B*S, H)

    # --- transformer encoder layers (4 pallas_calls per layer, no XLA transposes) ---
    for layer in params["layers"]:
        x3 = x.reshape(B, S, H)                               # free view
        ctx = fused_qkv_attention(x3, layer["wqkv"], layer["bqkv"], nH)
        x3 = attn_out_layernorm(ctx, layer["wo"], layer["bo"], x3,
                                layer["ln1_g"], layer["ln1_b"])
        x = x3.reshape(B * S, H)
        ff = dense(x, layer["w1"], layer["b1"], activation="gelu")
        x = dense_add_layernorm(ff, layer["w2"], layer["b2"], x,
                                layer["ln2_g"], layer["ln2_b"])

    # --- pooler + classification head ---
    cls = x.reshape(B, S, H)[:, 0, :]                                     # [CLS] token
    pooled = dense(cls, params["pool_w"], params["pool_b"], activation="tanh")
    logits = dense(pooled, params["cls_w"], params["cls_b"], out_dtype=jnp.float32)
    return logits


if __name__ == "__main__":
    key = jax.random.PRNGKey(0)
    k_param, k_ids = jax.random.split(key)

    params = init_params(k_param, CFG)

    B, S = 2, 8
    # `sample['pair']` in the PyTorch module == batch of token-id sequences.
    input_ids = jax.random.randint(k_ids, (B, S), 0, CFG["vocab"], dtype=jnp.int32)

    logits = bert_forward(params, input_ids, CFG)
    logits = jax.block_until_ready(logits)

    assert logits.shape == (B, CFG["num_labels"])
    assert bool(jnp.all(jnp.isfinite(logits)))
    print("KERNEL_OK")
</pallas_src>

<mosaic_0001>
module attributes {stable_mosaic.version = 11 : i64} {
  func.func @_ln_kernel(%arg0: i32, %arg1: memref<16x32xf32, #tpu.memory_space<vmem>>, %arg2: memref<1x32xf32, #tpu.memory_space<vmem>>, %arg3: memref<1x32xf32, #tpu.memory_space<vmem>>, %arg4: memref<16x32xbf16, #tpu.memory_space<vmem>>) attributes {dimension_semantics = [#tpu.dimension_semantics<parallel>], iteration_bounds = array<i64: 1>, scalar_prefetch = 0 : i64, scratch_operands = 0 : i64, tpu.core_type = #tpu.core_type<tc>, window_params = [{transform_indices = @transform_0, window_bounds = array<i64: 16, 32>}, {pipeline_mode = #tpu.pipeline_mode<synchronous>, transform_indices = @transform_1, window_bounds = array<i64: 1, 32>}, {pipeline_mode = #tpu.pipeline_mode<synchronous>, transform_indices = @transform_2, window_bounds = array<i64: 1, 32>}, {transform_indices = @transform_3, window_bounds = array<i64: 16, 32>}]} {
    %c0 = arith.constant 0 : index
    %c0_0 = arith.constant 0 : index
    %0 = vector.load %arg1[%c0, %c0_0] : memref<16x32xf32, #tpu.memory_space<vmem>>, vector<16x32xf32>
    %cst = arith.constant dense<0.000000e+00> : vector<16xf32>
    %1 = vector.multi_reduction <add>, %0, %cst [1] : vector<16x32xf32> to vector<16xf32>
    %2 = vector.shape_cast %1 : vector<16xf32> to vector<16x1xf32>
    %cst_1 = arith.constant 3.200000e+01 : f32
    %3 = vector.broadcast %cst_1 : f32 to vector<16x1xf32>
    %4 = arith.divf %2, %3 : vector<16x1xf32>
    %5 = vector.broadcast %4 : vector<16x1xf32> to vector<16x32xf32>
    %6 = arith.subf %0, %5 : vector<16x32xf32>
    %7 = arith.mulf %6, %6 : vector<16x32xf32>
    %cst_2 = arith.constant dense<0.000000e+00> : vector<16xf32>
    %8 = vector.multi_reduction <add>, %7, %cst_2 [1] : vector<16x32xf32> to vector<16xf32>
    %9 = vector.shape_cast %8 : vector<16xf32> to vector<16x1xf32>
    %cst_3 = arith.constant 3.200000e+01 : f32
    %10 = vector.broadcast %cst_3 : f32 to vector<16x1xf32>
    %11 = arith.divf %9, %10 : vector<16x1xf32>
    %12 = vector.broadcast %4 : vector<16x1xf32> to vector<16x32xf32>
    %13 = arith.subf %0, %12 : vector<16x32xf32>
    %cst_4 = arith.constant 9.99999996E-13 : f32
    %14 = vector.broadcast %cst_4 : f32 to vector<16x1xf32>
    %15 = arith.addf %11, %14 : vector<16x1xf32>
    %16 = math.rsqrt %15 : vector<16x1xf32>
    %17 = vector.broadcast %16 : vector<16x1xf32> to vector<16x32xf32>
    %18 = arith.mulf %13, %17 : vector<16x32xf32>
    %c0_5 = arith.constant 0 : index
    %c0_6 = arith.constant 0 : index
    %19 = vector.load %arg2[%c0_5, %c0_6] : memref<1x32xf32, #tpu.memory_space<vmem>>, vector<1x32xf32>
    %20 = vector.broadcast %19 : vector<1x32xf32> to vector<16x32xf32>
    %21 = arith.mulf %18, %20 : vector<16x32xf32>
    %c0_7 = arith.constant 0 : index
    %c0_8 = arith.constant 0 : index
    %22 = vector.load %arg3[%c0_7, %c0_8] : memref<1x32xf32, #tpu.memory_space<vmem>>, vector<1x32xf32>
    %23 = vector.broadcast %22 : vector<1x32xf32> to vector<16x32xf32>
    %24 = arith.addf %21, %23 : vector<16x32xf32>
    %25 = arith.truncf %24 : vector<16x32xf32> to vector<16x32xbf16>
    %c0_9 = arith.constant 0 : index
    %c0_10 = arith.constant 0 : index
    %26 = vector.load %arg4[%c0_9, %c0_10] : memref<16x32xbf16, #tpu.memory_space<vmem>>, vector<16x32xbf16>
    tpu.vector_store %arg4[%c0_9, %c0_10], %25 {strides = array<i32>} : memref<16x32xbf16, #tpu.memory_space<vmem>>, vector<16x32xbf16>,
    return
  }
  func.func @transform_0(%arg0: i32) -> (i32, i32) {
    %c0_i32 = arith.constant 0 : i32
    %c0_i32_0 = arith.constant 0 : i32
    return %arg0, %c0_i32 : i32, i32
  }
  func.func @transform_1(%arg0: i32) -> (i32, i32) {
    %c0_i32 = arith.constant 0 : i32
    %c0_i32_0 = arith.constant 0 : i32
    %c0_i32_1 = arith.constant 0 : i32
    return %c0_i32, %c0_i32_0 : i32, i32
  }
  func.func @transform_2(%arg0: i32) -> (i32, i32) {
    %c0_i32 = arith.constant 0 : i32
    %c0_i32_0 = arith.constant 0 : i32
    %c0_i32_1 = arith.constant 0 : i32
    return %c0_i32, %c0_i32_0 : i32, i32
  }
  func.func @transform_3(%arg0: i32) -> (i32, i32) {
    %c0_i32 = arith.constant 0 : i32
    %c0_i32_0 = arith.constant 0 : i32
    return %arg0, %c0_i32 : i32, i32
  }
}

</mosaic_0001>

<bundles_post_ra>
// kernel: tpu_custom_call.1
= control target key start
LH: loop header
LB: loop body
LE: loop exit
PB: predicated region body
PF: predicated region fallthrough
CT: control target
= control target key end

     0   :  { %8 = vsyncpa [#allocation3], 0  ;;  %s274_s0 = inlined_call_operand.hbm [shape: f32[16,32], index: 0, kind: input, shape index: {}]   ;;  %s275_s1 = inlined_call_operand.hbm [shape: f32[1,32], index: 1, kind: input, shape index: {}]   ;;  %s276_s2 = inlined_call_operand.vmem [shape: f32[1,32], index: 2, kind: input, shape index: {}]   ;;  %s277_s3 = inlined_call_operand.hbm [shape: bf16[16,32], index: 3, kind: output, shape index: {}]  }
   0x1   :  { %9 = vsyncpa [#allocation6], 0 }
   0x2   :  { %10 = vsyncpa [#allocation4], 0  ;;  %s15_s14 = sshll.u32 %s274_s0, 4  ;;  %s230_s15 = smov [#allocation2]   ;;  %s16_s14 = int_to_ptr.hbm [resolvable:$true] %s15_s14 }
   0x3   :  { %s17_s16 = sshll.u32 %s230_s15, 4  ;;  %s29_s19 = sshll.u32 %s275_s1, 4  ;;  %s18_s16 = int_to_ptr.vmem [resolvable:$true] %s17_s16  ;;  %s30_s19 = int_to_ptr.hbm [resolvable:$true] %s29_s19 }
   0x4   :  { %s231_s20 = smov 128   ;;  %s232_s21 = smov 8  }
   0x5   :  { %23 = dma.hbm_to_vmem [thread:$0]  %s16_s14, 256, %s18_s16, [#allocation3], %s231_s20, %s231_s20, %s232_s21  }
   0x6   :  { %s233_s22 = smov [#allocation5]  }
   0x7   :  { %s31_s23 = sshll.u32 %s233_s22, 4  ;;  %s32_s23 = int_to_ptr.vmem [resolvable:$true] %s31_s23 }
   0x8   :  { %34 = dma.hbm_to_vmem [thread:$0]  %s30_s19, 16, %s32_s23, [#allocation6]  }
   0x9   :  { %224 = dma.done.wait [#allocation3], 256  }
   0xa   :  { %225 = vsyncadd [#allocation3], 4294967040 }
   0xb   :  { %226 = dma.done.wait [#allocation6], 16  }
   0xc   :  { %227 = vsyncadd [#allocation6], 4294967280  ;;  %vm47_vm0 = vcmask 261120   ;;  %v45_v0 = vld [vmem:[#allocation2] sm:$0xff]  ;;  %v46_v2 = vld [vmem:[#allocation2 + $0x8] sm:$0xff]  ;;  %v234_v4 = vmov 32.0  }
   0xd   :  { %v48_v1 = vsel %vm47_vm0, %v45_v0, 0.0  ;;  %v51_v3 = vsel %vm47_vm0, %v46_v2, 0.0  ;;  %146 = vrcp.f32 %v234_v4  ;;  %v144_v35 = vld [vmem:[#allocation5] ss:$0 sm:$0xff]  ;;  %v145_v38 = vld [vmem:[%s276_s2] ss:$0 sm:$0xff] }
   0xe   :  { %49 = vadd.xlane.f32.xlu0 %v48_v1  ;;  %vm113_vm7 = vcmask 257024   ;;  %s235_s24 = smov [#allocation7]   ;;  %s122_s2 = sshll.u32 %s277_s3, 4  ;;  %s123_s2 = int_to_ptr.hbm [resolvable:$true] %s122_s2 }
   0xf   :  { %s120_s25 = sshll.u32 %s235_s24, 4  ;;  %s236_s28 = smov 64   ;;  %s121_s25 = int_to_ptr.vmem [resolvable:$true] %s120_s25 }
  0x10   :  { %s237_s29 = smov 4  }
  0x13   :  { %v147_v5 = vpop.eup %146 }
  0x14   :  { %v55_v6 = vmul.f32 32.0, %v147_v5  ;;  %vm59_vm1 = vweird.f32 %v147_v5 }
  0x16   :  { %52 = vadd.xlane.f32.xlu0 %v51_v3  ;;  %v56_v7 = vsub.f32 1.0, %v55_v6 }
  0x18   :  { %v57_v8 = vmul.f32 %v147_v5, %v56_v7 }
  0x1a   :  { %v58_v9 = vadd.f32 %v147_v5, %v57_v8 }
  0x1c   :  { %v60_v10 = vsel %vm59_vm1, %v147_v5, %v58_v9 }
  0x81   :  { %v50_v11 = vpop.xlane.xlu0 %49 }
  0x82   :  { %v61_v12 = vmul.f32 %v60_v10, %v50_v11 }
  0x84   :  { %v63_v13 = vsub.f32 %v45_v0, %v61_v12 }
  0x86   :  { %v65_v14 = vmul.f32 %v63_v13, %v63_v13 }
  0x88   :  { %v67_v15 = vsel %vm47_vm0, %v65_v14, 0.0 }
  0x89   :  { %68 = vadd.xlane.f32.xlu1 %v67_v15  ;;  %v53_v16 = vpop.xlane.xlu0 %52 }
  0x8a   :  { %v62_v17 = vmul.f32 %v60_v10, %v53_v16 }
  0x8c   :  { %v64_v18 = vsub.f32 %v46_v2, %v62_v17 }
  0x8e   :  { %v66_v19 = vmul.f32 %v64_v18, %v64_v18 }
  0x90   :  { %v70_v20 = vsel %vm47_vm0, %v66_v19, 0.0 }
  0x91   :  { %71 = vadd.xlane.f32.xlu1 %v70_v20 }
  0xfc   :  { %v69_v21 = vpop.xlane.xlu1 %68 }
  0xfd   :  { %v73_v22 = vmul.f32 %v69_v21, %v60_v10 }
  0xff   :  { %v75_v23 = vadd.f32 1e-12, %v73_v22 }
 0x101   :  { %148 = vrsqrt.f32 %v75_v23  ;;  %vm83_vm3 = vweird.f32 %v75_v23 }
 0x104   :  { %v72_v24 = vpop.xlane.xlu1 %71 }
 0x105   :  { %v74_v25 = vmul.f32 %v72_v24, %v60_v10 }
 0x107   :  { %v149_v26 = vpop.eup %148  ;;  %v76_v27 = vadd.f32 1e-12, %v74_v25 }
 0x108   :  { %v78_v28 = vmul.f32 %v149_v26, %v75_v23  ;;  %vm84_vm2 = vweird.f32 %v149_v26 }
 0x109   :  { %150 = vrsqrt.f32 %v76_v27  ;;  %vm85_vm4 = vmor %vm83_vm3, %vm84_vm2  ;;  %vm93_vm6 = vweird.f32 %v76_v27 }
 0x10a   :  { %v79_v29 = vmul.f32 %v149_v26, %v78_v28 }
 0x10c   :  { %v80_v30 = vmul.f32 0.5, %v79_v29 }
 0x10e   :  { %v81_v31 = vsub.f32 1.5, %v80_v30 }
 0x10f   :  { %v151_v32 = vpop.eup %150 }
 0x110   :  { %v82_v33 = vmul.f32 %v149_v26, %v81_v31  ;;  %v88_v34 = vmul.f32 %v151_v32, %v76_v27  ;;  %vm94_vm5 = vweird.f32 %v151_v32 }
 0x111   :  { %vm95_vm8 = vmor %vm93_vm6, %vm94_vm5 }
 0x112   :  { %v86_v36 = vsel %vm85_vm4, %v149_v26, %v82_v33  ;;  %v89_v37 = vmul.f32 %v151_v32, %v88_v34 }
 0x113   :  { %v97_v39 = vmul.f32 %v86_v36, %v63_v13 }
 0x114   :  { %v90_v40 = vmul.f32 0.5, %v89_v37 }
 0x115   :  { %v103_v41 = vmul.f32 %v144_v35, %v97_v39 }
 0x116   :  { %v91_v42 = vsub.f32 1.5, %v90_v40 }
 0x117   :  { %v109_v43 = vadd.f32 %v145_v38, %v103_v41 }
 0x118   :  { %v92_v44 = vmul.f32 %v151_v32, %v91_v42 }
 0x119   :  { %v111_v45 = vpack.c.bf16 %v109_v43, %v109_v43 }
 0x11a   :  { %v96_v46 = vsel %vm95_vm8, %v151_v32, %v92_v44 }
 0x11b   :  { %v98_v47 = vmul.f32 %v96_v46, %v64_v18  ;;  %114 = vst.msk [vmem:[#allocation7] sm:$0xf] %vm113_vm7, %v111_v45 }
 0x11d   :  { %v104_v48 = vmul.f32 %v144_v35, %v98_v47 }
 0x11f   :  { %v110_v49 = vadd.f32 %v145_v38, %v104_v48 }
 0x121   :  { %v112_v50 = vpack.c.bf16 %v110_v49, %v110_v49 }
 0x123   :  { %115 = vst.msk [vmem:[#allocation7 + $0x4] sm:$0xf] %vm113_vm7, %v112_v50 }
 0x124   :  { %128 = dma.vmem_to_hbm [thread:$0]  %s121_s25, 128, %s123_s2, [#allocation4], %s236_s28, %s236_s28, %s237_s29  }
 0x125   :  { %228 = dma.done.wait [#allocation4], 128  }
 0x126   :  { %229 = vsyncadd [#allocation4], 4294967168 }
 0x127   :  { %133 = vsyncpa [#allocation3], 1 }
 0x128   :  { %134 = vsyncpa [#allocation6], 1 }
 0x129   :  { %135 = vsyncpa [#allocation4], 1 }

</bundles_post_ra>
